<compile_context>
chip_gen: v7x
topology: tpu7x:2x2x1
jax: 0.10.0
libtpu: 0.0.40
codegen_flags: <defaults>
</compile_context>

<pallas_src>
import math

import jax
import jax.numpy as jnp
from jax.experimental import pallas as pl
from jax.experimental.pallas import tpu as pltpu

LANE = 128  # vreg lane width; each of q/k/v gets its own 128-lane segment.


def head_kernel(x_ref, w_ref, o_ref):
    # x_ref: (B*T, C) bf16   w_ref: (C, 3*LANE) bf16   o_ref: (B, T, LANE) f32
    B, T, _ = o_ref.shape
    C = x_ref.shape[1]
    scale = C ** -0.5  # n_embd scaling — matches the PyTorch module (not head_size)

    # Fused QKV projection: one MXU matmul, bf16 inputs, f32 accumulation.
    qkv = jnp.dot(x_ref[...], w_ref[...],
                  preferred_element_type=jnp.float32)       # (B*T, 3*LANE) f32
    qkv = qkv.reshape(B, T, 3 * LANE)

    # 128-lane-aligned slices — no intra-vreg lane extraction.  Scale folded
    # into q (T*LANE elements) instead of the (T,T) score matrix; elementwise
    # math stays f32 (v5e VPU has no bf16 path).
    q = (qkv[..., 0:LANE] * scale).astype(jnp.bfloat16)
    k = qkv[..., LANE:2 * LANE].astype(jnp.bfloat16)
    v = qkv[..., 2 * LANE:3 * LANE].astype(jnp.bfloat16)

    # Attention scores: batched contraction over the (padded) head dim — the
    # zero-padded lanes contribute exactly 0.  No explicit transpose.
    wei = jax.lax.dot_general(
        q, k,
        dimension_numbers=(((2,), (2,)), ((0,), (0,))),
        preferred_element_type=jnp.float32,
    )                                                        # (B, T, T) f32

    # Causal (tril) mask — built once at (T,T) and broadcast; large finite
    # negative avoids inf-inf -> NaN paths.
    row = jax.lax.broadcasted_iota(jnp.int32, (T, T), 0)
    col = jax.lax.broadcasted_iota(jnp.int32, (T, T), 1)
    causal = (col <= row)[None, :, :]
    wei = jnp.where(causal, wei, jnp.float32(-1e30))

    # Numerically stable softmax in f32; reciprocal goes to the EUP slot.
    m = jnp.max(wei, axis=-1, keepdims=True)
    e = jnp.exp(wei - m)
    p = e * pl.reciprocal(jnp.sum(e, axis=-1, keepdims=True), approx=True)

    # TODO(synk): nn.Dropout on attention weights is identity in eval mode;
    # training-mode dropout (pltpu.prng_random_bits mask) not applied here.

    out = jax.lax.dot_general(
        p.astype(jnp.bfloat16), v,
        dimension_numbers=(((2,), (1,)), ((0,), (0,))),
        preferred_element_type=jnp.float32,
    )                                                        # (B, T, LANE) f32
    o_ref[...] = out.astype(o_ref.dtype)   # lane-dense (128-wide) unmasked store


def head_forward(x, wk, wq, wv):
    """x: (B, T, C) f32; wk/wq/wv: (C, head_size) pre-transposed Linear weights."""
    B, T, C = x.shape
    H = wk.shape[1]
    assert H <= LANE, "head_size must fit in one 128-lane segment"

    # Fused, lane-aligned QKV weight: q in cols [0:H], k in [128:128+H],
    # v in [256:256+H]; everything else zero.  Zero columns are inert.
    w_qkv = jnp.zeros((C, 3 * LANE), dtype=jnp.float32)
    w_qkv = w_qkv.at[:, 0:H].set(wq)
    w_qkv = w_qkv.at[:, LANE:LANE + H].set(wk)
    w_qkv = w_qkv.at[:, 2 * LANE:2 * LANE + H].set(wv)
    w_qkv = w_qkv.astype(jnp.bfloat16)

    x_flat = x.reshape(B * T, C).astype(jnp.bfloat16)

    # Single invocation, no grid: whole problem lives in VMEM (a few KiB), so
    # any grid-step machinery would be pure overhead at this size.
    out_padded = pl.pallas_call(
        head_kernel,
        out_shape=jax.ShapeDtypeStruct((B, T, LANE), x.dtype),
        in_specs=[
            pl.BlockSpec(memory_space=pltpu.MemorySpace.VMEM),
            pl.BlockSpec(memory_space=pltpu.MemorySpace.VMEM),
        ],
        out_specs=pl.BlockSpec(memory_space=pltpu.MemorySpace.VMEM),
    )(x_flat, w_qkv)

    # Cheap XLA slice back to the true head size.
    return out_padded[:, :, :H]


def reference_head(x, wk, wq, wv):
    """Pure-JAX f32 reference mirroring the PyTorch forward (eval mode)."""
    B, T, C = x.shape
    k = x @ wk
    q = x @ wq
    v = x @ wv
    wei = jnp.einsum("btd,bsd->bts", q, k) * (C ** -0.5)
    mask = jnp.tril(jnp.ones((T, T), dtype=bool))
    wei = jnp.where(mask, wei, -jnp.inf)
    wei = jax.nn.softmax(wei, axis=-1)
    return wei @ v


if __name__ == "__main__":
    # config: n_embd=32, block_size=8 (seq length), head_size=16, dropout eval-mode
    B, T, C, H = 2, 8, 32, 16

    key = jax.random.PRNGKey(0)
    kx, kk, kq, kv = jax.random.split(key, 4)

    x = jax.random.normal(kx, (B, T, C), dtype=jnp.float32)

    # nn.Linear(C, H, bias=False) default init: U(-1/sqrt(C), 1/sqrt(C)),
    # weight shape (H, C); we store the transpose (C, H).
    bound = 1.0 / math.sqrt(C)
    wk = jax.random.uniform(kk, (C, H), minval=-bound, maxval=bound, dtype=jnp.float32)
    wq = jax.random.uniform(kq, (C, H), minval=-bound, maxval=bound, dtype=jnp.float32)
    wv = jax.random.uniform(kv, (C, H), minval=-bound, maxval=bound, dtype=jnp.float32)

    out = head_forward(x, wk, wq, wv)
    out = jax.block_until_ready(out)

    ref = reference_head(x, wk, wq, wv)
    assert out.shape == (B, T, H)
    # bf16 MXU inputs + approx reciprocal => compare against the f32 reference
    # with a tolerance matching bf16 precision.
    assert jnp.allclose(out, ref, atol=3e-2, rtol=3e-2), "mismatch vs reference"

    print("KERNEL_OK")
</pallas_src>

<mosaic_0001>
module attributes {stable_mosaic.version = 11 : i64} {
  func.func @head_kernel(%arg0: memref<16x32xbf16, #tpu.memory_space<vmem>>, %arg1: memref<32x384xbf16, #tpu.memory_space<vmem>>, %arg2: memref<2x8x128xf32, #tpu.memory_space<vmem>>) attributes {dimension_semantics = [], scalar_prefetch = 0 : i64, scratch_operands = 0 : i64, tpu.core_type = #tpu.core_type<tc>} {
    %c0 = arith.constant 0 : index
    %c0_0 = arith.constant 0 : index
    %0 = vector.load %arg0[%c0, %c0_0] : memref<16x32xbf16, #tpu.memory_space<vmem>>, vector<16x32xbf16>
    %c0_1 = arith.constant 0 : index
    %c0_2 = arith.constant 0 : index
    %1 = vector.load %arg1[%c0_1, %c0_2] : memref<32x384xbf16, #tpu.memory_space<vmem>>, vector<32x384xbf16>
    %cst = arith.constant dense<0.000000e+00> : vector<16x384xf32>
    %2 = tpu.matmul %0, %1, %cst {dimension_numbers = #tpu.dot_dimension_numbers<[1], [0], [0], [1], [0, 0, 1, 1], [], []>} : vector<16x32xbf16>, vector<32x384xbf16>, vector<16x384xf32> -> vector<16x384xf32>
    %3 = vector.shape_cast %2 : vector<16x384xf32> to vector<2x8x384xf32>
    %4 = vector.extract_strided_slice %3 {offsets = [0, 0, 0], sizes = [2, 8, 128], strides = [1, 1, 1]} : vector<2x8x384xf32> to vector<2x8x128xf32>
    %cst_3 = arith.constant 0.176776692 : f32
    %5 = vector.broadcast %cst_3 : f32 to vector<2x8x128xf32>
    %6 = arith.mulf %4, %5 : vector<2x8x128xf32>
    %7 = arith.truncf %6 : vector<2x8x128xf32> to vector<2x8x128xbf16>
    %8 = vector.extract_strided_slice %3 {offsets = [0, 0, 128], sizes = [2, 8, 128], strides = [1, 1, 1]} : vector<2x8x384xf32> to vector<2x8x128xf32>
    %9 = arith.truncf %8 : vector<2x8x128xf32> to vector<2x8x128xbf16>
    %10 = vector.extract_strided_slice %3 {offsets = [0, 0, 256], sizes = [2, 8, 128], strides = [1, 1, 1]} : vector<2x8x384xf32> to vector<2x8x128xf32>
    %11 = arith.truncf %10 : vector<2x8x128xf32> to vector<2x8x128xbf16>
    %cst_4 = arith.constant dense<0.000000e+00> : vector<2x8x8xf32>
    %12 = tpu.matmul %7, %9, %cst_4 {dimension_numbers = #tpu.dot_dimension_numbers<[2], [2], [1], [1], [0, 0, 0, 1, 1, 1], [0], [0]>} : vector<2x8x128xbf16>, vector<2x8x128xbf16>, vector<2x8x8xf32> -> vector<2x8x8xf32>
    %13 = tpu.iota {dimensions = array<i32: 0>} : vector<8x8xi32>
    %14 = tpu.iota {dimensions = array<i32: 1>} : vector<8x8xi32>
    %15 = arith.cmpi sle, %14, %13 : vector<8x8xi32>
    %16 = vector.shape_cast %15 : vector<8x8xi1> to vector<1x8x8xi1>
    %cst_5 = arith.constant -1.000000e+30 : f32
    %17 = vector.shape_cast %16 : vector<1x8x8xi1> to vector<1x8x8xi1>
    %18 = vector.broadcast %17 : vector<1x8x8xi1> to vector<2x8x8xi1>
    %19 = vector.broadcast %cst_5 : f32 to vector<2x8x8xf32>
    %20 = arith.select %18, %12, %19 : vector<2x8x8xi1>, vector<2x8x8xf32>
    %cst_6 = arith.constant dense<0xFF800000> : vector<2x8xf32>
    %21 = vector.multi_reduction <maximumf>, %20, %cst_6 [2] : vector<2x8x8xf32> to vector<2x8xf32>
    %22 = vector.shape_cast %21 : vector<2x8xf32> to vector<2x8x1xf32>
    %23 = vector.broadcast %22 : vector<2x8x1xf32> to vector<2x8x8xf32>
    %24 = arith.subf %20, %23 : vector<2x8x8xf32>
    %25 = math.exp %24 : vector<2x8x8xf32>
    %cst_7 = arith.constant dense<0.000000e+00> : vector<2x8xf32>
    %26 = vector.multi_reduction <add>, %25, %cst_7 [2] : vector<2x8x8xf32> to vector<2x8xf32>
    %27 = vector.shape_cast %26 : vector<2x8xf32> to vector<2x8x1xf32>
    %28 = tpu.reciprocal %27 {approx = true} : vector<2x8x1xf32> -> vector<2x8x1xf32>
    %29 = vector.broadcast %28 : vector<2x8x1xf32> to vector<2x8x8xf32>
    %30 = arith.mulf %25, %29 : vector<2x8x8xf32>
    %31 = arith.truncf %30 : vector<2x8x8xf32> to vector<2x8x8xbf16>
    %cst_8 = arith.constant dense<0.000000e+00> : vector<2x8x128xf32>
    %32 = tpu.matmul %31, %11, %cst_8 {dimension_numbers = #tpu.dot_dimension_numbers<[2], [1], [1], [2], [0, 0, 0, 1, 1, 2], [0], [0]>} : vector<2x8x8xbf16>, vector<2x8x128xbf16>, vector<2x8x128xf32> -> vector<2x8x128xf32>
    %c0_9 = arith.constant 0 : index
    %c0_10 = arith.constant 0 : index
    %c0_11 = arith.constant 0 : index
    %33 = vector.load %arg2[%c0_9, %c0_10, %c0_11] : memref<2x8x128xf32, #tpu.memory_space<vmem>>, vector<2x8x128xf32>
    tpu.vector_store %arg2[%c0_9, %c0_10, %c0_11], %32 {strides = array<i32>} : memref<2x8x128xf32, #tpu.memory_space<vmem>>, vector<2x8x128xf32>,
    return
  }
}

</mosaic_0001>

<bundles_post_ra>
// kernel: tpu_custom_call.1
= control target key start
LH: loop header
LB: loop body
LE: loop exit
PB: predicated region body
PF: predicated region fallthrough
CT: control target
= control target key end

     0   :  { %7 = vsyncpa [#allocation3], 0  ;;  %s640_s0 = inlined_call_operand.hbm [shape: bf16[16,32], index: 0, kind: input, shape index: {}]   ;;  %s641_s1 = inlined_call_operand.hbm [shape: bf16[32,384], index: 1, kind: input, shape index: {}]   ;;  %s642_s2 = inlined_call_operand.hbm [shape: f32[2,8,128], index: 2, kind: output, shape index: {}]  }
   0x1   :  { %8 = vsyncpa [#allocation6], 0 }
   0x2   :  { %9 = vsyncpa [#allocation4], 0  ;;  %s566_s9 = smov [#allocation2]   ;;  %s494_s13 = scalar_lea.hbm %s640_s0, 128 }
   0x3   :  { %s15_s10 = sshll.u32 %s566_s9, 4  ;;  %p495_p0 = scmp.ne.s32.totalorder %s640_s0, %s494_s13  ;;  %s16_s10 = int_to_ptr.vmem [resolvable:$true] %s15_s10 }
   0x4   :  { %p498_p1 = scmp.lt.u32.totalorder %s494_s13, %s640_s0 }
   0x6   :  { %p500_p2 = pnand %p498_p1, %p495_p0 }
   0x8   :  { %503 = shalt.err (!%p500_p2)
}
   0x9   :  { %s504_s18 = scalar_lea.vmem %s16_s10, 128  ;;  %p509_p4 = scmp.lt.s32.totalorder %s16_s10, %s16_s10 }
   0xa   :  { %p505_p3 = scmp.ne.s32.totalorder %s16_s10, %s504_s18  ;;  %p510_p5 = scmp.lt.s32.totalorder %s504_s18, %s504_s18 }
   0xc   :  { %p511_p6 = por %p510_p5, %p509_p4 }
   0xe   :  { %p512_p7 = pnand %p511_p6, %p505_p3 }
  0x10   :  { %515 = shalt.err (!%p512_p7)
}
  0x11   :  { %s567_s19 = smov 64   ;;  %s568_s20 = smov 4  }
  0x12   :  { %21 = dma.hbm_to_vmem [thread:$0]  %s640_s0, 128, %s16_s10, [#allocation3], %s567_s19, %s567_s19, %s568_s20  }
  0x13   :  { %s569_s23 = smov [#allocation5]   ;;  %s516_s27 = scalar_lea.hbm %s641_s1, 768 }
  0x14   :  { %s27_s24 = sshll.u32 %s569_s23, 4  ;;  %p517_p8 = scmp.ne.s32.totalorder %s641_s1, %s516_s27  ;;  %s28_s24 = int_to_ptr.vmem [resolvable:$true] %s27_s24 }
  0x15   :  { %p520_p9 = scmp.lt.u32.totalorder %s516_s27, %s641_s1 }
  0x17   :  { %p522_p10 = pnand %p520_p9, %p517_p8 }
  0x19   :  { %525 = shalt.err (!%p522_p10)
}
  0x1a   :  { %s526_s4 = scalar_lea.vmem %s28_s24, 768  ;;  %p531_p12 = scmp.lt.s32.totalorder %s28_s24, %s28_s24 }
  0x1b   :  { %p527_p11 = scmp.ne.s32.totalorder %s28_s24, %s526_s4  ;;  %p532_p13 = scmp.lt.s32.totalorder %s526_s4, %s526_s4 }
  0x1d   :  { %p533_p0 = por %p532_p13, %p531_p12 }
  0x1f   :  { %p534_p1 = pnand %p533_p0, %p527_p11 }
  0x21   :  { %537 = shalt.err (!%p534_p1)
}
  0x22   :  { %s570_s0 = smov 192   ;;  %s571_s5 = smov 12  }
  0x23   :  { %33 = dma.hbm_to_vmem [thread:$0]  %s641_s1, 768, %s28_s24, [#allocation6], %s570_s0, %s570_s0, %s571_s5  }
  0x24   :  { %560 = dma.done.wait [#allocation3], 128  }
  0x25   :  { %561 = vsyncadd [#allocation3], 4294967168 }
  0x26   :  { %562 = dma.done.wait [#allocation6], 768  }
  0x27   :  { %563 = vsyncadd [#allocation6], 4294966528  ;;  %v572_v0 = vmov 0   ;;  %v573_v1 = vmov 0.0   ;;  %v477_v2 = vld [vmem:[#allocation5 + $0x4] ss:$12 sps:$4 sm:$0xff]   ;;  %v264_v27 = vlaneseq }
  0x28   :  { %124 = vmatprep.mubr.bf16.mxu0 %v572_v0  ;;  %433 = vmatprep.subr.bf16.mxu1 %v573_v1  ;;  %v479_v3 = vld [vmem:[#allocation5] ss:$12 sps:$4 sm:$0xff]   ;;  %v480_v4 = vld [vmem:[#allocation5 + $0x1c] ss:$12 sps:$4 sm:$0xff]   ;;  %v482_v5 = vld [vmem:[#allocation5 + $0x18] ss:$12 sps:$4 sm:$0xff]  }
  0x29   :  { %92 = vmatprep.subr.bf16.mxu0 %v477_v2  ;;  %v484_v6 = vld [vmem:[#allocation5 + $0x8] ss:$12 sps:$4 sm:$0xff]   ;;  %v483_v7 = vld [vmem:[#allocation2] sm:$0xff]   ;;  %v485_v8 = vld [vmem:[#allocation5 + $0x20] ss:$12 sps:$4 sm:$0xff]   ;;  %vm88_vm0 = vcmask 261120  }
  0x2a   :  { %93 = vmatpush1.bf16.msra.mxu0 %v479_v3  ;;  %434 = vmatpush3.bf16.msra.mxu1 %v484_v6  ;;  %vm574_vm1 = vmmov 0   ;;  %vm301_vm2 = vcmask 1043456   ;;  %v265_v28 = vshrl.u32 %v264_v27, 7  ;;  %v267_v29 = vand.u32 127, %v264_v27  ;;  %s575_s1 = smov [#allocation7]  }
  0x2b   :  { %94 = vmatprep.subr.bf16.mxu0 %v480_v4  ;;  %435 = vmatprep.subr.bf16.mxu1 %v573_v1  ;;  %vm273_vm4 = vcmask 64512   ;;  %s398_s8 = sshll.u32 %s575_s1, 4  ;;  %s399_s8 = int_to_ptr.vmem [resolvable:$true] %s398_s8 }
  0x2c   :  { %437 = vmatprep.mubr.msk.bf16.mxu1 %vm574_vm1, %v573_v1  ;;  %vm268_vm3 = vcmp.le.s32.totalorder %v267_v29, %v265_v28  ;;  %s538_s9 = scalar_lea.vmem %s399_s8, 256  ;;  %p543_p3 = scmp.lt.s32.totalorder %s399_s8, %s399_s8 }
  0x2d   :  { %p539_p2 = scmp.ne.s32.totalorder %s399_s8, %s538_s9  ;;  %p544_p4 = scmp.lt.s32.totalorder %s538_s9, %s538_s9 }
  0x2e   :  { %95 = vmatpush1.bf16.msra.mxu0 %v482_v5  ;;  %436 = vmatpush3.bf16.msra.mxu1 %v485_v8 }
  0x2f   :  { %441 = vmatprep.subr.bf16.mxu0 %v573_v1  ;;  %447 = vmatprep.subr.bf16.mxu1 %v573_v1  ;;  %p545_p5 = por %p544_p4, %p543_p3 }
  0x31   :  { %418 = vmatmul.mubr.msk.bf16.vlgmr.msra.gmra.mrb[0].mxu0 %vm88_vm0, %v483_v7  ;;  %438 = vmatmul.mubr.msk.bf16.vlgmr.msra.gmra.mrb[0].mxu1 %vm88_vm0, %v483_v7  ;;  %p546_p6 = pnand %p545_p5, %p539_p2 }
  0x32   :  { %443 = vmatprep.mubr.msk.bf16.mxu0 %vm574_vm1, %v573_v1  ;;  %449 = vmatprep.mubr.msk.bf16.mxu1 %vm574_vm1, %v573_v1 }
 0x104   :  { %v126_v9 = vpop.f32.mrb[0].mxu0  ;;  %v169_v19 = vpop.f32.mrb[0].mxu1 }
 0x105   :  { %v128_v10 = vpop.f32.mrb[1].mxu0  ;;  %v176_v15 = vmul.f32 0.17677669, %v126_v9  ;;  %v182_v20 = vpack.c.bf16 %v169_v19, %v169_v19  ;;  %v439_v21 = vpop.f32.mrb[1].mxu1 }
 0x106   :  { %v180_v11 = vpack.c.bf16 %v128_v10, %v128_v10  ;;  %v130_v12 = vpop.f32.mrb[2].mxu0  ;;  %v172_v22 = vpop.f32.mrb[2].mxu1 }
 0x107   :  { %v132_v13 = vpop.f32.mrb[3].mxu0  ;;  %v177_v16 = vmul.f32 0.17677669, %v130_v12  ;;  %v178_v17 = vpack.c.bf16 %v176_v15, %v176_v15  ;;  %v303_v23 = vsel %vm301_vm2, %v182_v20, 0  ;;  %v183_v24 = vpack.c.bf16 %v172_v22, %v172_v22  ;;  %v440_v25 = vpop.f32.mrb[3].mxu1 }
 0x108   :  { %v181_v14 = vpack.c.bf16 %v132_v13, %v132_v13  ;;  %442 = vmatpush3.bf16.xpose.msra.mxu0 %v180_v11 }
 0x109   :  { %453 = vmatprep.subr.bf16.mxu0 %v573_v1  ;;  %v179_v18 = vpack.c.bf16 %v177_v16, %v177_v16  ;;  %v349_v26 = vsel %vm301_vm2, %v183_v24, 0 }
 0x10a   :  { %448 = vmatpush3.bf16.xpose.msra.mxu1 %v181_v14 }
 0x10b   :  { %459 = vmatprep.subr.bf16.mxu1 %v573_v1 }
 0x10f   :  { %444 = vmatmul.mubr.bf16.vlgmr.msra.gmra.mrb[4].mxu0 %v178_v17 }
 0x110   :  { %455 = vmatprep.mubr.msk.bf16.mxu0 %vm574_vm1, %v573_v1  ;;  %454 = vmatpush3.bf16.msra.mxu0 %v303_v23 }
 0x111   :  { %450 = vmatmul.mubr.bf16.vlgmr.msra.gmra.mrb[4].mxu1 %v179_v18 }
 0x112   :  { %461 = vmatprep.mubr.msk.bf16.mxu1 %vm574_vm1, %v573_v1  ;;  %460 = vmatpush3.bf16.msra.mxu1 %v349_v26 }
 0x1e2   :  { %v218_v30 = vpop.f32.mrb[4].mxu0 }
 0x1e3   :  { %v271_v31 = vsel %vm268_vm3, %v218_v30, -1e+30  ;;  %v445_v32 = vpop.f32.mrb[5].mxu0 }
 0x1e4   :  { %v221_v33 = vpop.f32.mrb[6].mxu0  ;;  %v258_v34 = vpop.f32.mrb[4].mxu1  ;;  %v274_v35 = vsel %vm273_vm4, %v271_v31, -inf }
 0x1e5   :  { %v272_v36 = vsel %vm268_vm3, %v258_v34, -1e+30  ;;  %275 = vmax.xlane.f32.xlu0 %v274_v35  ;;  %v446_v37 = vpop.f32.mrb[7].mxu0  ;;  %v451_v38 = vpop.f32.mrb[5].mxu1 }
 0x1e6   :  { %v261_v39 = vpop.f32.mrb[6].mxu1  ;;  %v277_v41 = vsel %vm273_vm4, %v272_v36, -inf }
 0x1e7   :  { %v452_v40 = vpop.f32.mrb[7].mxu1 }
 0x1e9   :  { %278 = vmax.xlane.f32.xlu0 %v277_v41 }
 0x272   :  { %v276_v42 = vpop.xlane.xlu0 %275 }
 0x273   :  { %v280_v43 = vsub.f32 %v271_v31, %v276_v42 }
 0x275   :  { %v282_v44 = vmul.f32 1.442695, %v280_v43 }
 0x276   :  { %v279_v45 = vpop.xlane.xlu0 %278 }
 0x277   :  { %486 = vpow2.f32 %v282_v44  ;;  %v281_v46 = vsub.f32 %v272_v36, %v279_v45 }
 0x279   :  { %v284_v47 = vmul.f32 1.442695, %v281_v46 }
 0x27b   :  { %488 = vpow2.f32 %v284_v47 }
 0x281   :  { %v487_v48 = vpop.eup %486 }
 0x282   :  { %v286_v49 = vsel %vm273_vm4, %v487_v48, 0.0 }
 0x283   :  { %287 = vadd.xlane.f32.xlu1 %v286_v49 }
 0x285   :  { %v489_v50 = vpop.eup %488 }
 0x286   :  { %v289_v51 = vsel %vm273_vm4, %v489_v50, 0.0 }
 0x287   :  { %290 = vadd.xlane.f32.xlu1 %v289_v51 }
 0x310   :  { %v288_v52 = vpop.xlane.xlu1 %287 }
 0x311   :  { %490 = vrcp.f32 %v288_v52 }
 0x314   :  { %v291_v53 = vpop.xlane.xlu1 %290 }
 0x315   :  { %492 = vrcp.f32 %v291_v53 }
 0x31b   :  { %v491_v54 = vpop.eup %490 }
 0x31c   :  { %v294_v55 = vmul.f32 %v491_v54, %v487_v48 }
 0x31e   :  { %v296_v56 = vpack.c.bf16 %v294_v55, %v294_v55 }
 0x31f   :  { %v493_v57 = vpop.eup %492 }
 0x320   :  { %v295_v58 = vmul.f32 %v493_v57, %v489_v50  ;;  %456 = vmatmul.mubr.msk.bf16.vlgmr.msra.gmra.mrb[8].mxu0 %vm273_vm4, %v296_v56 }
 0x322   :  { %v297_v59 = vpack.c.bf16 %v295_v58, %v295_v58 }
 0x324   :  { %462 = vmatmul.mubr.msk.bf16.vlgmr.msra.gmra.mrb[8].mxu1 %vm273_vm4, %v297_v59 }
 0x3f3   :  { %v339_v60 = vpop.f32.mrb[8].mxu0 }
 0x3f4   :  { %391 = vst [vmem:[#allocation7] sm:$0xff] %v339_v60  ;;  %v457_v61 = vpop.f32.mrb[9].mxu0 }
 0x3f5   :  { %v342_v62 = vpop.f32.mrb[10].mxu0 }
 0x3f6   :  { %v458_v63 = vpop.f32.mrb[11].mxu0 }
 0x3f7   :  { %v385_v0 = vpop.f32.mrb[8].mxu1 }
 0x3f8   :  { %392 = vst [vmem:[#allocation7 + $0x8] sm:$0xff] %v385_v0  ;;  %v463_v1 = vpop.f32.mrb[9].mxu1 }
 0x3f9   :  { %v388_v2 = vpop.f32.mrb[10].mxu1 }
 0x3fa   :  { %549 = shalt.err (!%p546_p6)
}
 0x3fb   :  { %s550_s12 = scalar_lea.hbm %s642_s2, 256 }
 0x3fc   :  { %p551_p7 = scmp.ne.s32.totalorder %s642_s2, %s550_s12  ;;  %p554_p8 = scmp.lt.u32.totalorder %s550_s12, %s642_s2 }
 0x3fe   :  { %p556_p9 = pnand %p554_p8, %p551_p7 }
 0x400   :  { %559 = shalt.err (!%p556_p9)
}
 0x401   :  { %s576_s17 = smov 128   ;;  %s577_s18 = smov 8   ;;  %v464_v3 = vpop.f32.mrb[11].mxu1 }
 0x402   :  { %404 = dma.vmem_to_hbm [thread:$0]  %s399_s8, 256, %s642_s2, [#allocation4], %s576_s17, %s576_s17, %s577_s18  }
 0x403   :  { %564 = dma.done.wait [#allocation4], 256  }
 0x404   :  { %565 = vsyncadd [#allocation4], 4294967040 }
 0x405   :  { %408 = vsyncpa [#allocation3], 1 }
 0x406   :  { %409 = vsyncpa [#allocation6], 1 }
 0x407   :  { %410 = vsyncpa [#allocation4], 1 }

</bundles_post_ra>
